<compile_context>
chip_gen: v7x
topology: tpu7x:2x2x1
jax: 0.10.0
libtpu: 0.0.40
codegen_flags: <defaults>
</compile_context>

<pallas_src>
import jax
import jax.numpy as jnp
from jax.experimental import pallas as pl
from jax.experimental.pallas import tpu as pltpu


def _round_up(x, m):
    return (x + m - 1) // m * m


# ----------------------------- kernels ------------------------------------

def _ste_fwd_kernel(x_ref, o_ref):
    # (x > 0) -> 1.0, else 0.0  (NaN compares false -> 0, matching torch)
    o_ref[...] = jnp.where(x_ref[...] > 0, 1.0, 0.0).astype(o_ref.dtype)


def _ste_bwd_kernel(g_ref, o_ref):
    # hardtanh(grad): clamp to [-1, 1]
    o_ref[...] = jnp.clip(g_ref[...], -1.0, 1.0).astype(o_ref.dtype)


# ----------------------------- wrapper -------------------------------------

def _chip_config():
    """Return (target_tile_bytes, vmem_limit_bytes) for the local TPU."""
    try:
        kind = jax.devices()[0].device_kind.lower()
    except Exception:
        kind = ""
    if "v7" in kind:
        # 3.2 TB/s HBM: 8 MiB blocks cut per-step overhead to ~6%.
        # 2 arrays x 2 buffers x 8 MiB = 32 MiB -> 48 MiB scoped limit
        # (still < v7x's 64 MiB physical VMEM).
        return 8 * 1024 * 1024, 48 * 1024 * 1024
    # v5e/v6e: 2-4 MiB blocks already sit at ~85-86% of HBM roofline.
    return 4 * 1024 * 1024, 32 * 1024 * 1024


def _run_elementwise(kernel, x, out_dtype):
    """Run an elementwise kernel over `x` using a lane-dense, tiled layout."""
    orig_shape = x.shape
    flat = x.reshape(-1)
    n = flat.shape[0]

    in_item = jnp.dtype(x.dtype).itemsize
    out_item = jnp.dtype(out_dtype).itemsize
    itemsize = max(in_item, out_item)            # conservative for VMEM sizing
    # Packed dtypes tile as (16,128)/(32,128): sublane multiple is dtype-aware.
    sublane = max(8, 32 // min(in_item, out_item))

    tile_bytes, vmem_limit = _chip_config()

    # Lane-dense last dim: a large multiple of 128 for unmasked stores; fall
    # back to 128 for tiny inputs so we don't over-pad toy tensors.
    lane = 512 if n >= 512 * sublane else 128

    rows = _round_up(pl.cdiv(n, lane), sublane)

    # Row tile so each block is ~tile_bytes; multiple of the sublane packing.
    tr_max = max(sublane,
                 (tile_bytes // (lane * itemsize)) // sublane * sublane)
    tr = min(rows, tr_max)

    padded = rows * lane
    if padded != n:
        # Tail pad only (< sublane*lane + lane elements). allow_input_fusion
        # lets XLA fuse this producer into the pallas_call operand instead of
        # materializing a padded HBM copy.
        flat = jnp.pad(flat, (0, padded - n))
    x2d = flat.reshape(rows, lane)

    y2d = pl.pallas_call(
        kernel,
        out_shape=jax.ShapeDtypeStruct((rows, lane), out_dtype),
        grid_spec=pl.GridSpec(
            grid=(pl.cdiv(rows, tr),),           # ragged last block, no over-pad
            in_specs=[pl.BlockSpec((tr, lane), lambda i: (i, 0))],
            out_specs=pl.BlockSpec((tr, lane), lambda i: (i, 0)),
        ),
        compiler_params=pltpu.CompilerParams(
            dimension_semantics=("parallel",),   # shards rows across v7x's 2 TCs
            vmem_limit_bytes=vmem_limit,
            allow_input_fusion=[True],
        ),
    )(x2d)

    y = y2d.reshape(-1)
    if padded != n:
        y = y[:n]
    return y.reshape(orig_shape)


# ----------------------------- custom VJP -----------------------------------

def _ste_forward(x):
    # Matches torch (input > 0).float(): always float32 output.
    return _run_elementwise(_ste_fwd_kernel, x, jnp.float32)


@jax.custom_vjp
def straight_through_estimator(x):
    return _ste_forward(x)


def _ste_vjp_fwd(x):
    # Zero-size residual carrying x's dtype so the returned cotangent matches
    # the primal input dtype (needed when x is not float32).
    return _ste_forward(x), jnp.zeros((0,), dtype=x.dtype)


def _ste_vjp_bwd(dtype_token, g):
    dx = _run_elementwise(_ste_bwd_kernel, g, dtype_token.dtype)
    return (dx,)


straight_through_estimator.defvjp(_ste_vjp_fwd, _ste_vjp_bwd)


# ------------------------------- main ---------------------------------------

if __name__ == "__main__":
    key = jax.random.PRNGKey(0)
    # NCHW, small shape consistent with the module.
    x = jax.random.normal(key, (2, 4, 16, 16), dtype=jnp.float32)

    y = jax.block_until_ready(straight_through_estimator(x))
    ref = (x > 0).astype(jnp.float32)
    assert y.shape == x.shape and y.dtype == jnp.float32
    assert bool(jnp.all(y == ref))

    # STE backward: hardtanh on the cotangent.
    g = jax.grad(lambda a: jnp.sum(straight_through_estimator(a) * 3.0))(x)
    g = jax.block_until_ready(g)
    assert g.dtype == x.dtype
    assert bool(jnp.all(g == jnp.clip(jnp.full_like(x, 3.0), -1.0, 1.0)))

    # Multi-block, lane-dense path (grid > 1, lane = 512, ragged-safe tiling).
    xl = jax.random.normal(jax.random.PRNGKey(1), (8, 64, 64, 64), dtype=jnp.float32)
    yl = jax.block_until_ready(straight_through_estimator(xl))
    assert bool(jnp.all(yl == (xl > 0).astype(jnp.float32)))

    # Padding / ragged-tail path (size not a multiple of 8*128).
    xo = jax.random.normal(jax.random.PRNGKey(2), (3, 5, 7, 11), dtype=jnp.float32)
    yo = jax.block_until_ready(straight_through_estimator(xo))
    assert bool(jnp.all(yo == (xo > 0).astype(jnp.float32)))

    # Packed-dtype input path (bf16 -> dtype-aware sublane rounding).
    xb = jax.random.normal(jax.random.PRNGKey(3), (2, 4, 16, 16)).astype(jnp.bfloat16)
    yb = jax.block_until_ready(straight_through_estimator(xb))
    assert yb.dtype == jnp.float32
    assert bool(jnp.all(yb == (xb > 0).astype(jnp.float32)))

    print("KERNEL_OK")
</pallas_src>

<mosaic_0001>
module attributes {stable_mosaic.version = 11 : i64} {
  func.func @_ste_fwd_kernel(%arg0: i32, %arg1: memref<16x128xf32, #tpu.memory_space<vmem>>, %arg2: memref<16x128xf32, #tpu.memory_space<vmem>>) attributes {dimension_semantics = [#tpu.dimension_semantics<parallel>], iteration_bounds = array<i64: 1>, scalar_prefetch = 0 : i64, scratch_operands = 0 : i64, tpu.core_type = #tpu.core_type<tc>, window_params = [{transform_indices = @transform_0, window_bounds = array<i64: 16, 128>}, {transform_indices = @transform_1, window_bounds = array<i64: 16, 128>}]} {
    %c0 = arith.constant 0 : index
    %c0_0 = arith.constant 0 : index
    %0 = vector.load %arg1[%c0, %c0_0] : memref<16x128xf32, #tpu.memory_space<vmem>>, vector<16x128xf32>
    %cst = arith.constant 0.000000e+00 : f32
    %1 = vector.broadcast %cst : f32 to vector<16x128xf32>
    %2 = arith.cmpf ogt, %0, %1 : vector<16x128xf32>
    %cst_1 = arith.constant 1.000000e+00 : f32
    %cst_2 = arith.constant 0.000000e+00 : f32
    %3 = vector.broadcast %cst_1 : f32 to vector<16x128xf32>
    %4 = vector.broadcast %cst_2 : f32 to vector<16x128xf32>
    %5 = arith.select %2, %3, %4 : vector<16x128xi1>, vector<16x128xf32>
    %c0_3 = arith.constant 0 : index
    %c0_4 = arith.constant 0 : index
    %6 = vector.load %arg2[%c0_3, %c0_4] : memref<16x128xf32, #tpu.memory_space<vmem>>, vector<16x128xf32>
    tpu.vector_store %arg2[%c0_3, %c0_4], %5 {strides = array<i32>} : memref<16x128xf32, #tpu.memory_space<vmem>>, vector<16x128xf32>,
    return
  }
  func.func @transform_0(%arg0: i32) -> (i32, i32) {
    %c0_i32 = arith.constant 0 : i32
    %c0_i32_0 = arith.constant 0 : i32
    return %arg0, %c0_i32 : i32, i32
  }
  func.func @transform_1(%arg0: i32) -> (i32, i32) {
    %c0_i32 = arith.constant 0 : i32
    %c0_i32_0 = arith.constant 0 : i32
    return %arg0, %c0_i32 : i32, i32
  }
}

</mosaic_0001>

<bundles_post_ra>
// kernel: tpu_custom_call.1
= control target key start
LH: loop header
LB: loop body
LE: loop exit
PB: predicated region body
PF: predicated region fallthrough
CT: control target
= control target key end

     0   :  { %6 = vsyncpa [#allocation3], 0  ;;  %s146_s0 = inlined_call_operand.hbm [shape: f32[16,128], index: 0, kind: input, shape index: {}]   ;;  %s147_s1 = inlined_call_operand.hbm [shape: f32[16,128], index: 1, kind: output, shape index: {}]  }
   0x1   :  { %7 = vsyncpa [#allocation4], 0  ;;  %s101_s6 = smov [#allocation2]   ;;  %s53_s10 = scalar_lea.hbm %s146_s0, 256 }
   0x2   :  { %s13_s7 = sshll.u32 %s101_s6, 4  ;;  %p54_p0 = scmp.ne.s32.totalorder %s146_s0, %s53_s10  ;;  %s14_s7 = int_to_ptr.vmem [resolvable:$true] %s13_s7 }
   0x3   :  { %p57_p1 = scmp.lt.u32.totalorder %s53_s10, %s146_s0 }
   0x5   :  { %p59_p2 = pnand %p57_p1, %p54_p0 }
   0x7   :  { %62 = shalt.err (!%p59_p2)
}
   0x8   :  { %s63_s15 = scalar_lea.vmem %s14_s7, 256  ;;  %p68_p4 = scmp.lt.s32.totalorder %s14_s7, %s14_s7 }
   0x9   :  { %p64_p3 = scmp.ne.s32.totalorder %s14_s7, %s63_s15  ;;  %p69_p5 = scmp.lt.s32.totalorder %s63_s15, %s63_s15 }
   0xb   :  { %p70_p6 = por %p69_p5, %p68_p4 }
   0xd   :  { %p71_p7 = pnand %p70_p6, %p64_p3 }
   0xf   :  { %74 = shalt.err (!%p71_p7)
}
  0x10   :  { %s102_s16 = smov 128   ;;  %s103_s17 = smov 8  }
  0x11   :  { %19 = dma.hbm_to_vmem [thread:$0]  %s146_s0, 256, %s14_s7, [#allocation3], %s102_s16, %s102_s16, %s103_s17  }
  0x12   :  { %97 = dma.done.wait [#allocation3], 256  }
  0x13   :  { %98 = vsyncadd [#allocation3], 4294967040  ;;  %s104_s20 = smov [#allocation5]   ;;  %v23_v0 = vld [vmem:[#allocation2] sm:$0xff]  ;;  %v24_v1 = vld [vmem:[#allocation2 + $0x8] sm:$0xff]  ;;  %v105_v2 = vmov 0.0  }
  0x14   :  { %s36_s21 = sshll.u32 %s104_s20, 4  ;;  %vm25_vm0 = vcmp.gt.f32.partialorder %v23_v0, 0.0  ;;  %vm26_vm1 = vcmp.gt.f32.partialorder %v24_v1, 0.0  ;;  %s37_s21 = int_to_ptr.vmem [resolvable:$true] %s36_s21 }
  0x15   :  { %v27_v3 = vsel %vm25_vm0, 1.0, %v105_v2  ;;  %v28_v4 = vsel %vm26_vm1, 1.0, %v105_v2  ;;  %s75_s22 = scalar_lea.vmem %s37_s21, 256  ;;  %p80_p9 = scmp.lt.s32.totalorder %s37_s21, %s37_s21 }
  0x16   :  { %29 = vst [vmem:[#allocation5] sm:$0xff] %v27_v3  ;;  %30 = vst [vmem:[#allocation5 + $0x8] sm:$0xff] %v28_v4  ;;  %p76_p8 = scmp.ne.s32.totalorder %s37_s21, %s75_s22  ;;  %p81_p10 = scmp.lt.s32.totalorder %s75_s22, %s75_s22 }
  0x18   :  { %p82_p11 = por %p81_p10, %p80_p9 }
  0x1a   :  { %p83_p12 = pnand %p82_p11, %p76_p8 }
  0x1c   :  { %86 = shalt.err (!%p83_p12)
}
  0x1d   :  { %s87_s24 = scalar_lea.hbm %s147_s1, 256 }
  0x1e   :  { %p88_p13 = scmp.ne.s32.totalorder %s147_s1, %s87_s24  ;;  %p91_p0 = scmp.lt.u32.totalorder %s87_s24, %s147_s1 }
  0x20   :  { %p93_p1 = pnand %p91_p0, %p88_p13 }
  0x22   :  { %96 = shalt.err (!%p93_p1)
}
  0x23   :  { %42 = dma.vmem_to_hbm [thread:$0]  %s37_s21, 256, %s147_s1, [#allocation4], %s102_s16, %s102_s16, %s103_s17  }
  0x24   :  { %99 = dma.done.wait [#allocation4], 256  }
  0x25   :  { %100 = vsyncadd [#allocation4], 4294967040 }
  0x26   :  { %46 = vsyncpa [#allocation3], 1 }
  0x27   :  { %47 = vsyncpa [#allocation4], 1 }

</bundles_post_ra>
